<compile_context>
chip_gen: v6e
topology: v6e:2x2x1
jax: 0.10.0
libtpu: 0.0.40
codegen_flags: <defaults>
</compile_context>

<pallas_src>
import jax
import jax.numpy as jnp
from jax.experimental import pallas as pl
from jax.experimental.pallas import tpu as pltpu


def _round_up(x, m):
    return ((x + m - 1) // m) * m


def _vmem_limit_bytes():
    # Generation-aware VMEM cap with ~20% headroom for compiler scratch.
    cap = 128 * 1024 * 1024
    try:
        info = pltpu.get_tpu_info()
        cap = int(getattr(info, "vmem_capacity_bytes", cap))
    except Exception:
        pass
    return max(32 * 1024 * 1024, int(cap * 0.8))


def _make_arma_kernel(n_layers_after_pre, h_cols):
    """Fused forward kernel. h_cols = padded width*hidden lane count."""

    def kernel(*refs):
        x_ref, l_ref, wpre_ref, bpre_ref, btpre_ref, *rest = refs
        layers = [rest[4 * i: 4 * i + 4] for i in range(n_layers_after_pre)]
        pool_ref, o_ref = rest[4 * n_layers_after_pre:]

        x = x_ref[...]      # (Np, fin_p) bf16 — skip/merge input, resident all layers
        L = l_ref[...]      # (Np, Np)    bf16 — I - D^{-1}A, loaded once for all layers

        def lap(h_f32):
            # LaplacianAction(normalized=True) as a single MXU dot (norm folded into L)
            return jnp.dot(L, h_f32.astype(jnp.bfloat16),
                           preferred_element_type=jnp.float32)

        # ---- preprocess ConvSkip: [W | Wt] fused into one 2H-wide dot ----
        hw = jnp.dot(x, wpre_ref[...], preferred_element_type=jnp.float32)  # (Np, 2H)
        h_lin = hw[:, :h_cols] + bpre_ref[...]
        skip = hw[:, h_cols:] + btpre_ref[...]
        act = jnp.maximum(lap(h_lin) + skip, 0.0)                           # (Np, H) f32

        # ---- middle WideConvSkip blocks + postprocess (uniform loop) ----
        # TODO(synk): WideConvSkip.forward in the reference has inconsistent shapes
        # (data.unsqueeze(1) into a grouped Conv1d) and never assigns
        # self.activation / self.connected; implemented with the clearly intended
        # semantics: grouped 1x1 conv -> normalized Laplacian -> +skip -> relu.
        for (wbd_ref, b_ref, wt_ref, bt_ref) in layers:
            act_b = act.astype(jnp.bfloat16)        # cast once; carried state is bf16
            h_lin = jnp.dot(act_b, wbd_ref[...],
                            preferred_element_type=jnp.float32) + b_ref[...]
            skip = jnp.dot(x, wt_ref[...],
                           preferred_element_type=jnp.float32) + bt_ref[...]
            act = jnp.maximum(lap(h_lin) + skip, 0.0)

        # ---- fused reshape(N,-1,width) + adaptive_avg_pool1d(.,1): one dot,
        # 1/width scale folded into the (f32) pooling matrix ----
        o_ref[...] = jnp.dot(act, pool_ref[...], preferred_element_type=jnp.float32)

    return kernel


def arma_forward_pallas(params, data, adj, *, width):
    """ARMA forward: padding/layout in XLA, all layers + pooling in one Pallas kernel."""
    n, in_size = data.shape
    hidden = params["pre"]["w"].shape[1] // width
    out_size = params["post"]["w"].shape[2]
    n_blocks = len(params["blocks"])

    n_p = _round_up(n, 128)                       # node dim (also L's lane dim)
    fin_p = _round_up(in_size, 128)
    h_cat = _round_up(width * hidden, 128)        # concatenated hidden lanes
    oc_cat = _round_up(width * out_size, 128)     # concatenated post-layer lanes
    o_p = _round_up(out_size, 128)                # pooled output lanes

    # ---- layer-invariant graph operands (DMA'd to VMEM once) ----
    x_p = jnp.pad(data, ((0, n_p - n), (0, fin_p - in_size))).astype(jnp.bfloat16)
    deg = jnp.sum(adj, axis=-1, keepdims=True)
    inv_deg = 1.0 / jnp.maximum(deg, 1.0)         # also guards isolated nodes
    lap_mat = jnp.eye(n, dtype=jnp.float32) - inv_deg * adj   # normalization folded in
    l_p = jnp.pad(lap_mat, ((0, n_p - n), (0, n_p - n))).astype(jnp.bfloat16)

    # ---- weight packing: flat group-major layout, zero-padded to 128 lanes ----
    def pad_mat(w, rows, cols):
        return jnp.zeros((rows, cols), jnp.float32).at[:w.shape[0], :w.shape[1]].set(w)

    def pad_bias(b, cols):
        return jnp.zeros((1, cols), jnp.float32).at[0, :b.shape[0]].set(b)

    def block_diag(wg, rows_p, cols_p):
        # grouped 1x1 Conv1d weights (width, fin_g, fout_g) -> block-diagonal matrix
        _, fin_g, fout_g = wg.shape
        m = jnp.zeros((rows_p, cols_p), jnp.float32)
        for g in range(width):
            m = m.at[g * fin_g:(g + 1) * fin_g, g * fout_g:(g + 1) * fout_g].set(wg[g])
        return m

    p = params["pre"]
    w_pre_fused = jnp.concatenate(
        [pad_mat(p["w"], fin_p, h_cat), pad_mat(p["wt"], fin_p, h_cat)], axis=1
    ).astype(jnp.bfloat16)                                          # (fin_p, 2H)
    args = [x_p, l_p, w_pre_fused, pad_bias(p["b"], h_cat), pad_bias(p["bt"], h_cat)]

    for blk in params["blocks"]:
        args += [block_diag(blk["w"], h_cat, h_cat).astype(jnp.bfloat16),
                 pad_bias(blk["b"], h_cat),
                 pad_mat(blk["wt"], fin_p, h_cat).astype(jnp.bfloat16),
                 pad_bias(blk["bt"], h_cat)]
    p = params["post"]
    args += [block_diag(p["w"], h_cat, oc_cat).astype(jnp.bfloat16),
             pad_bias(p["b"], oc_cat),
             pad_mat(p["wt"], fin_p, oc_cat).astype(jnp.bfloat16),
             pad_bias(p["bt"], oc_cat)]

    # pooling matrix implementing out.reshape(N, -1, width).mean(-1) on the flat
    # group-major feature order; 1/width scale folded in (kept f32 for exactness)
    pool = jnp.zeros((oc_cat, o_p), jnp.float32)
    for f in range(out_size):
        for w in range(width):
            pool = pool.at[f * width + w, f].set(1.0 / width)
    args.append(pool)

    vmem = pl.BlockSpec(memory_space=pltpu.MemorySpace.VMEM)
    out_p = pl.pallas_call(
        _make_arma_kernel(n_blocks + 1, h_cat),
        out_shape=jax.ShapeDtypeStruct((n_p, o_p), jnp.float32),
        in_specs=[vmem] * len(args),
        out_specs=vmem,
        compiler_params=pltpu.CompilerParams(vmem_limit_bytes=_vmem_limit_bytes()),
    )(*args)
    return out_p[:n, :out_size][:, :, None]       # (N, out_size, 1)


# ---------------- pure-JAX reference (tolerance sanity check) ----------------
def arma_reference(params, data, adj, *, width):
    deg = jnp.sum(adj, axis=-1, keepdims=True)
    inv_deg = 1.0 / jnp.maximum(deg, 1.0)

    def lap(h):
        return h - inv_deg * (adj @ h)

    def conv_skip(x, merge, w, b, wt, bt):
        return jax.nn.relu(lap(x @ w + b) + merge @ wt + bt)

    def wide_conv_skip(x, merge, wg, bg, wt, bt):
        w_, fin, _ = wg.shape
        parts = [x[:, g * fin:(g + 1) * fin] @ wg[g] for g in range(w_)]
        h = jnp.concatenate(parts, axis=-1) + bg
        return jax.nn.relu(lap(h) + merge @ wt + bt)

    p = params["pre"]
    out = conv_skip(data, data, p["w"], p["b"], p["wt"], p["bt"])
    for blk in params["blocks"]:
        out = wide_conv_skip(out, data, blk["w"], blk["b"], blk["wt"], blk["bt"])
    p = params["post"]
    out = wide_conv_skip(out, data, p["w"], p["b"], p["wt"], p["bt"])
    out = out.reshape(data.shape[0], -1, width)
    return jnp.mean(out, axis=-1, keepdims=True)


def init_params(key, in_size, hidden, out_size, width, depth):
    keys = iter(jax.random.split(key, 8 + 8 * depth))

    def lin(fin, fout):
        s = 1.0 / jnp.sqrt(fin)
        w = jax.random.uniform(next(keys), (fin, fout), jnp.float32, -s, s)
        b = jax.random.uniform(next(keys), (fout,), jnp.float32, -s, s)
        return w, b

    def grouped(fin_g, fout_g):
        # nn.Conv1d(width*fin_g, width*fout_g, 1, groups=width): per-group blocks
        s = 1.0 / jnp.sqrt(fin_g)
        w = jax.random.uniform(next(keys), (width, fin_g, fout_g), jnp.float32, -s, s)
        b = jax.random.uniform(next(keys), (width * fout_g,), jnp.float32, -s, s)
        return w, b

    params = {}
    w, b = lin(in_size, hidden * width)
    wt, bt = lin(in_size, hidden * width)
    params["pre"] = dict(w=w, b=b, wt=wt, bt=bt)
    blocks = []
    for _ in range(depth - 2):
        w, b = grouped(hidden, hidden)
        wt, bt = lin(in_size, hidden * width)
        blocks.append(dict(w=w, b=b, wt=wt, bt=bt))
    params["blocks"] = blocks
    w, b = grouped(hidden, out_size)
    wt, bt = lin(in_size, out_size * width)
    params["post"] = dict(w=w, b=b, wt=wt, bt=bt)
    return params


if __name__ == "__main__":
    key = jax.random.PRNGKey(0)
    k_data, k_param = jax.random.split(key)

    # Small graph: N nodes, ring adjacency (every node has degree 2)
    N, in_size, hidden, out_size, width, depth = 16, 8, 8, 4, 3, 3
    data = jax.random.normal(k_data, (N, in_size), jnp.float32)
    idx = jnp.arange(N)
    adj = jnp.zeros((N, N), jnp.float32)
    adj = adj.at[idx, (idx + 1) % N].set(1.0)
    adj = adj.at[idx, (idx - 1) % N].set(1.0)

    params = init_params(k_param, in_size, hidden, out_size, width, depth)

    # Round weights/data to the bf16 values the kernel consumes so the f32
    # reference isolates only the in-kernel numerics.
    bf16_round = lambda t: t.astype(jnp.bfloat16).astype(jnp.float32)
    params_q = jax.tree_util.tree_map(bf16_round, params)
    data_q = bf16_round(data)

    fwd = jax.jit(arma_forward_pallas, static_argnames=("width",))
    out = fwd(params_q, data_q, adj, width=width)
    jax.block_until_ready(out)

    assert out.shape == (N, out_size, 1), out.shape
    ref = arma_reference(params_q, data_q, adj, width=width)
    err = float(jnp.max(jnp.abs(out - ref)))
    assert err < 1e-1, f"kernel/reference mismatch: max abs err = {err}"
    print("KERNEL_OK")
</pallas_src>

<mosaic_0001>
module attributes {stable_mosaic.version = 11 : i64} {
  func.func @kernel(%arg0: memref<128x128xbf16, #tpu.memory_space<vmem>>, %arg1: memref<128x128xbf16, #tpu.memory_space<vmem>>, %arg2: memref<128x256xbf16, #tpu.memory_space<vmem>>, %arg3: memref<1x128xf32, #tpu.memory_space<vmem>>, %arg4: memref<1x128xf32, #tpu.memory_space<vmem>>, %arg5: memref<128x128xbf16, #tpu.memory_space<vmem>>, %arg6: memref<1x128xf32, #tpu.memory_space<vmem>>, %arg7: memref<128x128xbf16, #tpu.memory_space<vmem>>, %arg8: memref<1x128xf32, #tpu.memory_space<vmem>>, %arg9: memref<128x128xbf16, #tpu.memory_space<vmem>>, %arg10: memref<1x128xf32, #tpu.memory_space<vmem>>, %arg11: memref<128x128xbf16, #tpu.memory_space<vmem>>, %arg12: memref<1x128xf32, #tpu.memory_space<vmem>>, %arg13: memref<128x128xf32, #tpu.memory_space<vmem>>, %arg14: memref<128x128xf32, #tpu.memory_space<vmem>>) attributes {dimension_semantics = [], scalar_prefetch = 0 : i64, scratch_operands = 0 : i64, tpu.core_type = #tpu.core_type<tc>} {
    %c0 = arith.constant 0 : index
    %c0_0 = arith.constant 0 : index
    %0 = vector.load %arg0[%c0, %c0_0] : memref<128x128xbf16, #tpu.memory_space<vmem>>, vector<128x128xbf16>
    %c0_1 = arith.constant 0 : index
    %c0_2 = arith.constant 0 : index
    %1 = vector.load %arg1[%c0_1, %c0_2] : memref<128x128xbf16, #tpu.memory_space<vmem>>, vector<128x128xbf16>
    %c0_3 = arith.constant 0 : index
    %c0_4 = arith.constant 0 : index
    %2 = vector.load %arg2[%c0_3, %c0_4] : memref<128x256xbf16, #tpu.memory_space<vmem>>, vector<128x256xbf16>
    %cst = arith.constant dense<0.000000e+00> : vector<128x256xf32>
    %3 = tpu.matmul %0, %2, %cst {dimension_numbers = #tpu.dot_dimension_numbers<[1], [0], [0], [1], [0, 0, 1, 1], [], []>} : vector<128x128xbf16>, vector<128x256xbf16>, vector<128x256xf32> -> vector<128x256xf32>
    %4 = vector.extract_strided_slice %3 {offsets = [0, 0], sizes = [128, 128], strides = [1, 1]} : vector<128x256xf32> to vector<128x128xf32>
    %c0_5 = arith.constant 0 : index
    %c0_6 = arith.constant 0 : index
    %5 = vector.load %arg3[%c0_5, %c0_6] : memref<1x128xf32, #tpu.memory_space<vmem>>, vector<1x128xf32>
    %6 = vector.broadcast %5 : vector<1x128xf32> to vector<128x128xf32>
    %7 = arith.addf %4, %6 : vector<128x128xf32>
    %8 = vector.extract_strided_slice %3 {offsets = [0, 128], sizes = [128, 128], strides = [1, 1]} : vector<128x256xf32> to vector<128x128xf32>
    %c0_7 = arith.constant 0 : index
    %c0_8 = arith.constant 0 : index
    %9 = vector.load %arg4[%c0_7, %c0_8] : memref<1x128xf32, #tpu.memory_space<vmem>>, vector<1x128xf32>
    %10 = vector.broadcast %9 : vector<1x128xf32> to vector<128x128xf32>
    %11 = arith.addf %8, %10 : vector<128x128xf32>
    %12 = arith.truncf %7 : vector<128x128xf32> to vector<128x128xbf16>
    %cst_9 = arith.constant dense<0.000000e+00> : vector<128x128xf32>
    %13 = tpu.matmul %1, %12, %cst_9 {dimension_numbers = #tpu.dot_dimension_numbers<[1], [0], [0], [1], [0, 0, 1, 1], [], []>} : vector<128x128xbf16>, vector<128x128xbf16>, vector<128x128xf32> -> vector<128x128xf32>
    %14 = arith.addf %13, %11 : vector<128x128xf32>
    %cst_10 = arith.constant 0.000000e+00 : f32
    %15 = vector.broadcast %cst_10 : f32 to vector<128x128xf32>
    %16 = arith.maximumf %14, %15 : vector<128x128xf32>
    %17 = arith.truncf %16 : vector<128x128xf32> to vector<128x128xbf16>
    %c0_11 = arith.constant 0 : index
    %c0_12 = arith.constant 0 : index
    %18 = vector.load %arg5[%c0_11, %c0_12] : memref<128x128xbf16, #tpu.memory_space<vmem>>, vector<128x128xbf16>
    %cst_13 = arith.constant dense<0.000000e+00> : vector<128x128xf32>
    %19 = tpu.matmul %17, %18, %cst_13 {dimension_numbers = #tpu.dot_dimension_numbers<[1], [0], [0], [1], [0, 0, 1, 1], [], []>} : vector<128x128xbf16>, vector<128x128xbf16>, vector<128x128xf32> -> vector<128x128xf32>
    %c0_14 = arith.constant 0 : index
    %c0_15 = arith.constant 0 : index
    %20 = vector.load %arg6[%c0_14, %c0_15] : memref<1x128xf32, #tpu.memory_space<vmem>>, vector<1x128xf32>
    %21 = vector.broadcast %20 : vector<1x128xf32> to vector<128x128xf32>
    %22 = arith.addf %19, %21 : vector<128x128xf32>
    %c0_16 = arith.constant 0 : index
    %c0_17 = arith.constant 0 : index
    %23 = vector.load %arg7[%c0_16, %c0_17] : memref<128x128xbf16, #tpu.memory_space<vmem>>, vector<128x128xbf16>
    %cst_18 = arith.constant dense<0.000000e+00> : vector<128x128xf32>
    %24 = tpu.matmul %0, %23, %cst_18 {dimension_numbers = #tpu.dot_dimension_numbers<[1], [0], [0], [1], [0, 0, 1, 1], [], []>} : vector<128x128xbf16>, vector<128x128xbf16>, vector<128x128xf32> -> vector<128x128xf32>
    %c0_19 = arith.constant 0 : index
    %c0_20 = arith.constant 0 : index
    %25 = vector.load %arg8[%c0_19, %c0_20] : memref<1x128xf32, #tpu.memory_space<vmem>>, vector<1x128xf32>
    %26 = vector.broadcast %25 : vector<1x128xf32> to vector<128x128xf32>
    %27 = arith.addf %24, %26 : vector<128x128xf32>
    %28 = arith.truncf %22 : vector<128x128xf32> to vector<128x128xbf16>
    %cst_21 = arith.constant dense<0.000000e+00> : vector<128x128xf32>
    %29 = tpu.matmul %1, %28, %cst_21 {dimension_numbers = #tpu.dot_dimension_numbers<[1], [0], [0], [1], [0, 0, 1, 1], [], []>} : vector<128x128xbf16>, vector<128x128xbf16>, vector<128x128xf32> -> vector<128x128xf32>
    %30 = arith.addf %29, %27 : vector<128x128xf32>
    %cst_22 = arith.constant 0.000000e+00 : f32
    %31 = vector.broadcast %cst_22 : f32 to vector<128x128xf32>
    %32 = arith.maximumf %30, %31 : vector<128x128xf32>
    %33 = arith.truncf %32 : vector<128x128xf32> to vector<128x128xbf16>
    %c0_23 = arith.constant 0 : index
    %c0_24 = arith.constant 0 : index
    %34 = vector.load %arg9[%c0_23, %c0_24] : memref<128x128xbf16, #tpu.memory_space<vmem>>, vector<128x128xbf16>
    %cst_25 = arith.constant dense<0.000000e+00> : vector<128x128xf32>
    %35 = tpu.matmul %33, %34, %cst_25 {dimension_numbers = #tpu.dot_dimension_numbers<[1], [0], [0], [1], [0, 0, 1, 1], [], []>} : vector<128x128xbf16>, vector<128x128xbf16>, vector<128x128xf32> -> vector<128x128xf32>
    %c0_26 = arith.constant 0 : index
    %c0_27 = arith.constant 0 : index
    %36 = vector.load %arg10[%c0_26, %c0_27] : memref<1x128xf32, #tpu.memory_space<vmem>>, vector<1x128xf32>
    %37 = vector.broadcast %36 : vector<1x128xf32> to vector<128x128xf32>
    %38 = arith.addf %35, %37 : vector<128x128xf32>
    %c0_28 = arith.constant 0 : index
    %c0_29 = arith.constant 0 : index
    %39 = vector.load %arg11[%c0_28, %c0_29] : memref<128x128xbf16, #tpu.memory_space<vmem>>, vector<128x128xbf16>
    %cst_30 = arith.constant dense<0.000000e+00> : vector<128x128xf32>
    %40 = tpu.matmul %0, %39, %cst_30 {dimension_numbers = #tpu.dot_dimension_numbers<[1], [0], [0], [1], [0, 0, 1, 1], [], []>} : vector<128x128xbf16>, vector<128x128xbf16>, vector<128x128xf32> -> vector<128x128xf32>
    %c0_31 = arith.constant 0 : index
    %c0_32 = arith.constant 0 : index
    %41 = vector.load %arg12[%c0_31, %c0_32] : memref<1x128xf32, #tpu.memory_space<vmem>>, vector<1x128xf32>
    %42 = vector.broadcast %41 : vector<1x128xf32> to vector<128x128xf32>
    %43 = arith.addf %40, %42 : vector<128x128xf32>
    %44 = arith.truncf %38 : vector<128x128xf32> to vector<128x128xbf16>
    %cst_33 = arith.constant dense<0.000000e+00> : vector<128x128xf32>
    %45 = tpu.matmul %1, %44, %cst_33 {dimension_numbers = #tpu.dot_dimension_numbers<[1], [0], [0], [1], [0, 0, 1, 1], [], []>} : vector<128x128xbf16>, vector<128x128xbf16>, vector<128x128xf32> -> vector<128x128xf32>
    %46 = arith.addf %45, %43 : vector<128x128xf32>
    %cst_34 = arith.constant 0.000000e+00 : f32
    %47 = vector.broadcast %cst_34 : f32 to vector<128x128xf32>
    %48 = arith.maximumf %46, %47 : vector<128x128xf32>
    %c0_35 = arith.constant 0 : index
    %c0_36 = arith.constant 0 : index
    %49 = vector.load %arg13[%c0_35, %c0_36] : memref<128x128xf32, #tpu.memory_space<vmem>>, vector<128x128xf32>
    %cst_37 = arith.constant dense<0.000000e+00> : vector<128x128xf32>
    %50 = tpu.matmul %48, %49, %cst_37 {dimension_numbers = #tpu.dot_dimension_numbers<[1], [0], [0], [1], [0, 0, 1, 1], [], []>} : vector<128x128xf32>, vector<128x128xf32>, vector<128x128xf32> -> vector<128x128xf32>
    %c0_38 = arith.constant 0 : index
    %c0_39 = arith.constant 0 : index
    %51 = vector.load %arg14[%c0_38, %c0_39] : memref<128x128xf32, #tpu.memory_space<vmem>>, vector<128x128xf32>
    tpu.vector_store %arg14[%c0_38, %c0_39], %50 {strides = array<i32>} : memref<128x128xf32, #tpu.memory_space<vmem>>, vector<128x128xf32>,
    return
  }
}

</mosaic_0001>

<bundles_post_ra>
// kernel: arma_forward_pallas.1
= control target key start
LH: loop header
LB: loop body
LE: loop exit
PB: predicated region body
PF: predicated region fallthrough
CT: control target
= control target key end

     0   :  { %v2239_v1 = vmov 0   ;;  %s2822_s2 = inlined_call_operand.vmem [shape: bf16[128,256], index: 2, kind: input, shape index: {}]   ;;  %s2823_s0 = inlined_call_operand.vmem [shape: bf16[128,128], index: 0, kind: input, shape index: {}]   ;;  %s2824_s1 = inlined_call_operand.vmem [shape: bf16[128,128], index: 1, kind: input, shape index: {}]   ;;  %s2825_s5 = inlined_call_operand.vmem [shape: bf16[128,128], index: 5, kind: input, shape index: {}]   ;;  %s2826_s3 = inlined_call_operand.vmem [shape: f32[1,128], index: 3, kind: input, shape index: {}]   ;;  %s2827_s7 = inlined_call_operand.vmem [shape: bf16[128,128], index: 7, kind: input, shape index: {}]   ;;  %s2828_s4 = inlined_call_operand.vmem [shape: f32[1,128], index: 4, kind: input, shape index: {}]   ;;  %s2829_s9 = inlined_call_operand.vmem [shape: bf16[128,128], index: 9, kind: input, shape index: {}]   ;;  %s2830_s6 = inlined_call_operand.vmem [shape: f32[1,128], index: 6, kind: input, shape index: {}]   ;;  %s2831_s8 = inlined_call_operand.vmem [shape: f32[1,128], index: 8, kind: input, shape index: {}]   ;;  %s2832_s11 = inlined_call_operand.vmem [shape: bf16[128,128], index: 11, kind: input, shape index: {}]   ;;  %s2833_s13 = inlined_call_operand.vmem [shape: f32[128,128], index: 13, kind: input, shape index: {}]   ;;  %s2834_s10 = inlined_call_operand.vmem [shape: f32[1,128], index: 10, kind: input, shape index: {}]   ;;  %s2835_s12 = inlined_call_operand.vmem [shape: f32[1,128], index: 12, kind: input, shape index: {}]   ;;  %s2836_s14 = inlined_call_operand.vmem [shape: f32[128,128], index: 14, kind: output, shape index: {}]  }
   0x1   :  { %v2158_v0 = vld [vmem:[%s2822_s2 + $0x74] ss:$8 sps:$4 sm:$0xff]   ;;  %256 = vmatprep.mubr.bf16.mxu0 %v2239_v1  ;;  %v2160_v2 = vld [vmem:[%s2822_s2 + $0x70] ss:$8 sps:$4 sm:$0xff]   ;;  %v2161_v3 = vld [vmem:[%s2822_s2 + $0x64] ss:$8 sps:$4 sm:$0xff]  }
   0x2   :  { %224 = vmatprep.subr.bf16.mxu0 %v2158_v0  ;;  %v2163_v4 = vld [vmem:[%s2822_s2 + $0x60] ss:$8 sps:$4 sm:$0xff]   ;;  %v2164_v5 = vld [vmem:[%s2822_s2 + $0x54] ss:$8 sps:$4 sm:$0xff]   ;;  %v2166_v6 = vld [vmem:[%s2822_s2 + $0x50] ss:$8 sps:$4 sm:$0xff]  }
   0x3   :  { %225 = vmatpush1.bf16.msra.mxu0 %v2160_v2  ;;  %v2167_v7 = vld [vmem:[%s2822_s2 + $0x44] ss:$8 sps:$4 sm:$0xff]   ;;  %v2169_v8 = vld [vmem:[%s2822_s2 + $0x40] ss:$8 sps:$4 sm:$0xff]   ;;  %v2170_v9 = vld [vmem:[%s2822_s2 + $0x34] ss:$8 sps:$4 sm:$0xff]  }
   0x4   :  { %226 = vmatprep.subr.bf16.mxu0 %v2161_v3  ;;  %v2172_v10 = vld [vmem:[%s2822_s2 + $0x30] ss:$8 sps:$4 sm:$0xff]   ;;  %v2173_v11 = vld [vmem:[%s2822_s2 + $0x24] ss:$8 sps:$4 sm:$0xff]   ;;  %v2175_v12 = vld [vmem:[%s2822_s2 + $0x20] ss:$8 sps:$4 sm:$0xff]  }
   0x5   :  { %v2176_v13 = vld [vmem:[%s2822_s2 + $0x14] ss:$8 sps:$4 sm:$0xff]   ;;  %v2178_v14 = vld [vmem:[%s2822_s2 + $0x10] ss:$8 sps:$4 sm:$0xff]   ;;  %v2179_v15 = vld [vmem:[%s2822_s2 + $0x4] ss:$8 sps:$4 sm:$0xff]  }
   0x6   :  { %v2181_v16 = vld [vmem:[%s2822_s2] ss:$8 sps:$4 sm:$0xff]   ;;  %v2378_v19 = vld [vmem:[%s2823_s0 + $0x10] sm:$0xff]   ;;  %v2384_v20 = vld [vmem:[%s2823_s0 + $0x18] sm:$0xff]  }
   0x7   :  { %227 = vmatpush1.bf16.msra.mxu0 %v2163_v4  ;;  %v2366_v17 = vld [vmem:[%s2823_s0] sm:$0xff]   ;;  %v2372_v18 = vld [vmem:[%s2823_s0 + $0x8] sm:$0xff]   ;;  %v2402_v23 = vld [vmem:[%s2823_s0 + $0x30] sm:$0xff]  }
   0x8   :  { %228 = vmatprep.subr.bf16.mxu0 %v2164_v5  ;;  %v2390_v21 = vld [vmem:[%s2823_s0 + $0x20] sm:$0xff]   ;;  %v2396_v22 = vld [vmem:[%s2823_s0 + $0x28] sm:$0xff]   ;;  %v2408_v24 = vld [vmem:[%s2823_s0 + $0x38] sm:$0xff]  }
   0x9   :  { %v2415_v25 = vld [vmem:[%s2824_s1] sm:$0xff]  }
   0xa   :  { %1893 = vmatprep.mubr.bf16.mxu1 %v2415_v25  ;;  %v1687_v27 = vld [vmem:[%s2826_s3] ss:$0 sm:$0xff] }
   0xb   :  { %229 = vmatpush1.bf16.msra.mxu0 %v2166_v6 }
   0xc   :  { %230 = vmatprep.subr.bf16.mxu0 %v2167_v7 }
   0xf   :  { %231 = vmatpush1.bf16.msra.mxu0 %v2169_v8 }
  0x10   :  { %232 = vmatprep.subr.bf16.mxu0 %v2170_v9 }
  0x13   :  { %233 = vmatpush1.bf16.msra.mxu0 %v2172_v10 }
  0x14   :  { %234 = vmatprep.subr.bf16.mxu0 %v2173_v11 }
  0x17   :  { %235 = vmatpush1.bf16.msra.mxu0 %v2175_v12 }
  0x18   :  { %236 = vmatprep.subr.bf16.mxu0 %v2176_v13 }
  0x1b   :  { %237 = vmatpush1.bf16.msra.mxu0 %v2178_v14 }
  0x1c   :  { %238 = vmatprep.subr.bf16.mxu0 %v2179_v15 }
  0x1f   :  { %239 = vmatpush1.bf16.msra.mxu0 %v2181_v16 }
  0x22   :  { %257 = vmatmul.mubr.bf16.vlgmr.msra.gmra.mxu0 %v2366_v17 }
  0x23   :  { %266 = vmatprep.mubr.bf16.mxu0 %v2239_v1 }
  0x2a   :  { %267 = vmatmul.mubr.bf16.gmra.mxu0 %v2372_v18 }
  0x2b   :  { %276 = vmatprep.mubr.bf16.mxu0 %v2239_v1 }
  0x32   :  { %277 = vmatmul.mubr.bf16.gmra.mxu0 %v2378_v19 }
  0x33   :  { %286 = vmatprep.mubr.bf16.mxu0 %v2239_v1 }
  0x3a   :  { %287 = vmatmul.mubr.bf16.gmra.mxu0 %v2384_v20 }
  0x3b   :  { %296 = vmatprep.mubr.bf16.mxu0 %v2239_v1 }
  0x42   :  { %297 = vmatmul.mubr.bf16.gmra.mxu0 %v2390_v21 }
  0x43   :  { %306 = vmatprep.mubr.bf16.mxu0 %v2239_v1 }
  0x4a   :  { %307 = vmatmul.mubr.bf16.gmra.mxu0 %v2396_v22 }
  0x4b   :  { %316 = vmatprep.mubr.bf16.mxu0 %v2239_v1 }
  0x52   :  { %317 = vmatmul.mubr.bf16.gmra.mxu0 %v2402_v23 }
  0x53   :  { %326 = vmatprep.mubr.bf16.mxu0 %v2239_v1 }
  0x5a   :  { %327 = vmatmul.mubr.bf16.gmra.mxu0 %v2408_v24 }
  0x5b   :  { %1957 = vmatprep.mubr.bf16.mxu0 %v2366_v17 }
  0xe2   :  { %v258_v26 = vpop.f32.mrf.mxu0 }
  0xe3   :  { %v344_v30 = vadd.f32 %v1687_v27, %v258_v26 }
  0xe4   :  { %v2421_v28 = vpop.f32.mrf.mxu0 }
  0xe6   :  { %v262_v29 = vpop.f32.mrf.mxu0 }
  0xe7   :  { %v345_v31 = vadd.f32 %v1687_v27, %v262_v29  ;;  %v2198_v29 = vld [vmem:[%s2825_s5 + $0x38] sm:$0xff]  }
  0xe8   :  { %v2423_v32 = vpop.f32.mrf.mxu0 }
  0xe9   :  { %v2425_v33 = vpack.c.bf16 %v345_v31, %v344_v30  ;;  %v2460_v30 = vld [vmem:[%s2824_s1 + $0x8] sm:$0xff]   ;;  %v2199_v31 = vld [vmem:[%s2825_s5 + $0x30] sm:$0xff]  }
  0xea   :  { %v268_v34 = vpop.f32.mrf.mxu0 }
  0xeb   :  { %v346_v37 = vadd.f32 %v1687_v27, %v268_v34  ;;  %v2479_v34 = vld [vmem:[%s2824_s1 + $0x18] sm:$0xff]  }
  0xec   :  { %v2427_v35 = vpop.f32.mrf.mxu0 }
  0xee   :  { %v272_v36 = vpop.f32.mrf.mxu0 }
  0xef   :  { %v347_v38 = vadd.f32 %v1687_v27, %v272_v36  ;;  %v2484_v36 = vld [vmem:[%s2824_s1 + $0x20] sm:$0xff]  }
  0xf0   :  { %v2429_v39 = vpop.f32.mrf.mxu0 }
  0xf1   :  { %v384_v40 = vpack.c.bf16 %v347_v38, %v346_v37  ;;  %v2201_v37 = vld [vmem:[%s2825_s5 + $0x20] sm:$0xff]   ;;  %v2202_v38 = vld [vmem:[%s2825_s5 + $0x18] sm:$0xff]  }
  0xf2   :  { %v278_v41 = vpop.f32.mrf.mxu0 }
  0xf3   :  { %v348_v16 = vadd.f32 %v1687_v27, %v278_v41  ;;  %v2502_v41 = vld [vmem:[%s2824_s1 + $0x30] sm:$0xff]  }
  0xf4   :  { %v2431_v42 = vpop.f32.mrf.mxu0 }
  0xf6   :  { %v282_v43 = vpop.f32.mrf.mxu0 }
  0xf7   :  { %v349_v14 = vadd.f32 %v1687_v27, %v282_v43  ;;  %v2509_v43 = vld [vmem:[%s2824_s1 + $0x38] sm:$0xff]  }
  0xf8   :  { %v2433_v44 = vpop.f32.mrf.mxu0 }
  0xf9   :  { %v385_v26 = vpack.c.bf16 %v349_v14, %v348_v16 }
  0xfa   :  { %v288_v45 = vpop.f32.mrf.mxu0 }
  0xfb   :  { %v350_v13 = vadd.f32 %v1687_v27, %v288_v45  ;;  %v2203_v45 = vld [vmem:[%s2825_s5 + $0x10] sm:$0xff]  }
  0xfc   :  { %v2435_v46 = vpop.f32.mrf.mxu0 }
  0xfe   :  { %v292_v47 = vpop.f32.mrf.mxu0 }
  0xff   :  { %v351_v11 = vadd.f32 %v1687_v27, %v292_v47  ;;  %v2204_v47 = vld [vmem:[%s2825_s5 + $0x8] sm:$0xff]  }
 0x100   :  { %v2437_v48 = vpop.f32.mrf.mxu0 }
 0x101   :  { %v386_v15 = vpack.c.bf16 %v351_v11, %v350_v13 }
 0x102   :  { %v298_v49 = vpop.f32.mrf.mxu0 }
 0x103   :  { %v352_v10 = vadd.f32 %v1687_v27, %v298_v49  ;;  %v2205_v49 = vld [vmem:[%s2825_s5] sm:$0xff]  }
 0x104   :  { %v2439_v50 = vpop.f32.mrf.mxu0 }
 0x106   :  { %v302_v51 = vpop.f32.mrf.mxu0 }
 0x107   :  { %v353_v8 = vadd.f32 %v1687_v27, %v302_v51  ;;  %v2206_v51 = vld [vmem:[%s2827_s7 + $0x38] sm:$0xff]  }
 0x108   :  { %v2441_v52 = vpop.f32.mrf.mxu0  ;;  %1941 = vmatprep.subr.bf16.mxu0 %v2206_v51 }
 0x109   :  { %v387_v12 = vpack.c.bf16 %v353_v8, %v352_v10  ;;  %1942 = vmatpush3.bf16.msra.mxu0 %v2206_v51 }
 0x10a   :  { %v308_v53 = vpop.f32.mrf.mxu0 }
 0x10b   :  { %v354_v7 = vadd.f32 %v1687_v27, %v308_v53  ;;  %v2527_v53 = vld [vmem:[%s2828_s4] ss:$0 sm:$0xff] }
 0x10c   :  { %v2443_v54 = vpop.f32.mrf.mxu0  ;;  %v372_v16 = vadd.f32 %v2527_v53, %v2433_v44  ;;  %v375_v51 = vadd.f32 %v2527_v53, %v2439_v50 }
 0x10e   :  { %v312_v55 = vpop.f32.mrf.mxu0 }
 0x10f   :  { %v355_v5 = vadd.f32 %v1687_v27, %v312_v55 }
 0x110   :  { %v2445_v56 = vpop.f32.mrf.mxu0 }
 0x111   :  { %v388_v9 = vpack.c.bf16 %v355_v5, %v354_v7  ;;  %v378_v44 = vadd.f32 %v2527_v53, %v2445_v56 }
 0x112   :  { %v318_v57 = vpop.f32.mrf.mxu0 }
 0x113   :  { %v356_v3 = vadd.f32 %v1687_v27, %v318_v57  ;;  %v369_v57 = vadd.f32 %v2527_v53, %v2427_v35  ;;  %v373_v35 = vadd.f32 %v2527_v53, %v2435_v46 }
 0x114   :  { %v2447_v58 = vpop.f32.mrf.mxu0 }
 0x116   :  { %v322_v59 = vpop.f32.mrf.mxu0 }
 0x117   :  { %v357_v0 = vadd.f32 %v1687_v27, %v322_v59 }
 0x118   :  { %v2449_v60 = vpop.f32.mrf.mxu0 }
 0x119   :  { %v389_v6 = vpack.c.bf16 %v357_v0, %v356_v3 }
 0x11a   :  { %v328_v61 = vpop.f32.mrf.mxu0 }
 0x11b   :  { %v358_v1 = vadd.f32 %v1687_v27, %v328_v61  ;;  %v367_v61 = vadd.f32 %v2527_v53, %v2421_v28 }
 0x11c   :  { %v2451_v62 = vpop.f32.mrf.mxu0 }
 0x11e   :  { %v332_v63 = vpop.f32.mrf.mxu0 }
 0x11f   :  { %v359_v2 = vadd.f32 %v1687_v27, %v332_v63  ;;  %v2466_v27 = vld [vmem:[%s2824_s1 + $0x10] sm:$0xff]   ;;  %v370_v63 = vadd.f32 %v2527_v53, %v2429_v39  ;;  %v371_v39 = vadd.f32 %v2527_v53, %v2431_v42  ;;  %v377_v42 = vadd.f32 %v2527_v53, %v2443_v54 }
 0x121   :  { %v390_v4 = vpack.c.bf16 %v359_v2, %v358_v1  ;;  %v368_v2 = vadd.f32 %v2527_v53, %v2423_v32  ;;  %v374_v32 = vadd.f32 %v2527_v53, %v2437_v48 }
 0x123   :  { %1877 = vmatprep.subr.bf16.mxu1 %v390_v4 }
 0x124   :  { %1878 = vmatpush3.bf16.msra.mxu1 %v390_v4 }
 0x125   :  { %1879 = vmatprep.subr.bf16.mxu1 %v389_v6 }
 0x128   :  { %1880 = vmatpush3.bf16.msra.mxu1 %v389_v6 }
 0x129   :  { %1881 = vmatprep.subr.bf16.mxu1 %v388_v9 }
 0x12c   :  { %1882 = vmatpush3.bf16.msra.mxu1 %v388_v9 }
 0x12d   :  { %1883 = vmatprep.subr.bf16.mxu1 %v387_v12 }
 0x130   :  { %1884 = vmatpush3.bf16.msra.mxu1 %v387_v12 }
 0x131   :  { %1885 = vmatprep.subr.bf16.mxu1 %v386_v15 }
 0x134   :  { %1886 = vmatpush3.bf16.msra.mxu1 %v386_v15 }
 0x135   :  { %1887 = vmatprep.subr.bf16.mxu1 %v385_v26 }
 0x138   :  { %1888 = vmatpush3.bf16.msra.mxu1 %v385_v26 }
 0x139   :  { %1889 = vmatprep.subr.bf16.mxu1 %v384_v40 }
 0x13c   :  { %1890 = vmatpush3.bf16.msra.mxu1 %v384_v40  ;;  %v2497_v40 = vld [vmem:[%s2824_s1 + $0x28] sm:$0xff]  }
 0x13d   :  { %1891 = vmatprep.subr.bf16.mxu1 %v2425_v33 }
 0x140   :  { %1892 = vmatpush3.bf16.msra.mxu1 %v2425_v33  ;;  %v2200_v33 = vld [vmem:[%s2825_s5 + $0x28] sm:$0xff]  }
 0x141   :  { %1909 = vmatprep.subr.bf16.mxu1 %v2198_v29 }
 0x143   :  { %1894 = vmatmul.mubr.bf16.vlgmr.msra.gmra.mxu1 %v2460_v30 }
 0x144   :  { %1897 = vmatprep.mubr.bf16.mxu1 %v2466_v27  ;;  %1910 = vmatpush3.bf16.msra.mxu1 %v2198_v29 }
 0x145   :  { %1911 = vmatprep.subr.bf16.mxu1 %v2199_v31 }
 0x148   :  { %1912 = vmatpush3.bf16.msra.mxu1 %v2199_v31 }
 0x149   :  { %1913 = vmatprep.subr.bf16.mxu1 %v2200_v33 }
 0x14b   :  { %1898 = vmatmul.mubr.bf16.gmra.mxu1 %v2479_v34 }
 0x14c   :  { %1901 = vmatprep.mubr.bf16.mxu1 %v2484_v36  ;;  %1914 = vmatpush3.bf16.msra.mxu1 %v2200_v33 }
 0x14d   :  { %1915 = vmatprep.subr.bf16.mxu1 %v2201_v37 }
 0x150   :  { %1916 = vmatpush3.bf16.msra.mxu1 %v2201_v37 }
 0x151   :  { %1917 = vmatprep.subr.bf16.mxu1 %v2202_v38 }
 0x153   :  { %1902 = vmatmul.mubr.bf16.gmra.mxu1 %v2497_v40 }
 0x154   :  { %1905 = vmatprep.mubr.bf16.mxu1 %v2502_v41  ;;  %1918 = vmatpush3.bf16.msra.mxu1 %v2202_v38 }
 0x155   :  { %1919 = vmatprep.subr.bf16.mxu1 %v2203_v45 }
 0x158   :  { %1920 = vmatpush3.bf16.msra.mxu1 %v2203_v45 }
 0x159   :  { %1921 = vmatprep.subr.bf16.mxu1 %v2204_v47 }
 0x15b   :  { %1906 = vmatmul.mubr.bf16.gmra.mxu1 %v2509_v43 }
 0x15c   :  { %1922 = vmatpush3.bf16.msra.mxu1 %v2204_v47 }
 0x15d   :  { %1923 = vmatprep.subr.bf16.mxu1 %v2205_v49 }
 0x160   :  { %1924 = vmatpush3.bf16.msra.mxu1 %v2205_v49 }
 0x203   :  { %v1895_v55 = vpop.f32.mrf.mxu1 }
 0x204   :  { %v482_v0 = vadd.f32 %v1895_v55, %v369_v57 }
 0x205   :  { %v473_v59 = vpop.f32.mrf.mxu1 }
 0x206   :  { %v474_v3 = vadd.f32 %v473_v59, %v367_v61  ;;  %v538_v6 = vmax.f32 %v482_v0, 0.0  ;;  %v376_v61 = vadd.f32 %v2527_v53, %v2441_v52 }
 0x207   :  { %v1896_v1 = vpop.f32.mrf.mxu1 }
 0x208   :  { %v485_v4 = vadd.f32 %v1896_v1, %v370_v63  ;;  %v536_v10 = vmax.f32 %v474_v3, 0.0 }
 0x209   :  { %v476_v5 = vpop.f32.mrf.mxu1 }
 0x20a   :  { %v539_v7 = vmax.f32 %v485_v4, 0.0  ;;  %v477_v8 = vadd.f32 %v476_v5, %v368_v2  ;;  %v334_v4 = vpop.f32.mrf.mxu0 }
 0x20b   :  { %v1899_v9 = vpop.f32.mrf.mxu1 }
 0x20c   :  { %v553_v28 = vpack.c.bf16 %v539_v7, %v538_v6  ;;  %v537_v11 = vmax.f32 %v477_v8, 0.0  ;;  %v498_v14 = vadd.f32 %v1899_v9, %v373_v35  ;;  %v379_v8 = vadd.f32 %v2527_v53, %v2447_v58 }
 0x20d   :  { %v489_v12 = vpop.f32.mrf.mxu1  ;;  %v382_v9 = vadd.f32 %v2527_v53, %v334_v4  ;;  %v381_v35 = vadd.f32 %v2527_v53, %v2451_v62  ;;  %v2208_v62 = vld [vmem:[%s2827_s7 + $0x28] sm:$0xff]  }
 0x20e   :  { %v552_v13 = vpack.c.bf16 %v537_v11, %v536_v10  ;;  %v490_v26 = vadd.f32 %v489_v12, %v371_v39  ;;  %v542_v31 = vmax.f32 %v498_v14, 0.0 }
 0x20f   :  { %v1900_v15 = vpop.f32.mrf.mxu1 }
 0x210   :  { %v501_v29 = vadd.f32 %v1900_v15, %v374_v32  ;;  %1925 = vmatprep.mubr.bf16.mxu1 %v552_v13  ;;  %v540_v45 = vmax.f32 %v490_v26, 0.0 }
 0x211   :  { %v492_v46 = vpop.f32.mrf.mxu1  ;;  %1926 = vmatmul.mubr.bf16.vlgmr.msra.gmra.mxu1 %v553_v28  ;;  %v380_v28 = vadd.f32 %v2527_v53, %v2449_v60  ;;  %v2207_v60 = vld [vmem:[%s2827_s7 + $0x30] sm:$0xff]   ;;  %v2209_v53 = vld [vmem:[%s2827_s7 + $0x20] sm:$0xff]  }
 0x212   :  { %v543_v33 = vmax.f32 %v501_v29, 0.0  ;;  %v493_v37 = vadd.f32 %v492_v46, %v372_v16  ;;  %1943 = vmatprep.subr.bf16.mxu0 %v2207_v60  ;;  %v2210_v46 = vld [vmem:[%s2827_s7 + $0x18] sm:$0xff]  }
 0x213   :  { %v1903_v38 = vpop.f32.mrf.mxu1  ;;  %1944 = vmatpush3.bf16.msra.mxu0 %v2207_v60 }
 0x214   :  { %v555_v48 = vpack.c.bf16 %v543_v33, %v542_v31  ;;  %v541_v47 = vmax.f32 %v493_v37, 0.0  ;;  %v514_v57 = vadd.f32 %v1903_v38, %v377_v42  ;;  %1945 = vmatprep.subr.bf16.mxu0 %v2208_v62  ;;  %v2211_v31 = vld [vmem:[%s2827_s7 + $0x10] sm:$0xff]   ;;  %v2212_v33 = vld [vmem:[%s2827_s7 + $0x8] sm:$0xff]   ;;  %v2213_v37 = vld [vmem:[%s2827_s7] sm:$0xff]  }
 0x215   :  { %v505_v49 = vpop.f32.mrf.mxu1  ;;  %v2214_v38 = vld [vmem:[%s2829_s9 + $0x38] sm:$0xff]  }
 0x216   :  { %v554_v55 = vpack.c.bf16 %v541_v47, %v540_v45  ;;  %v506_v63 = vadd.f32 %v505_v49, %v375_v51  ;;  %v546_v1 = vmax.f32 %v514_v57, 0.0 }
 0x217   :  { %v1904_v59 = vpop.f32.mrf.mxu1  ;;  %1946 = vmatpush3.bf16.msra.mxu0 %v2208_v62 }
 0x218   :  { %v517_v0 = vadd.f32 %v1904_v59, %v378_v44  ;;  %1929 = vmatprep.mubr.bf16.mxu1 %v554_v55  ;;  %v544_v50 = vmax.f32 %v506_v63, 0.0  ;;  %1947 = vmatprep.subr.bf16.mxu0 %v2209_v53  ;;  %v1697_v63 = vld [vmem:[%s2830_s6] ss:$0 sm:$0xff] }
 0x219   :  { %v508_v54 = vpop.f32.mrf.mxu1  ;;  %1930 = vmatmul.mubr.bf16.gmra.mxu1 %v555_v48 }
 0x21a   :  { %v547_v2 = vmax.f32 %v517_v0, 0.0  ;;  %v509_v3 = vadd.f32 %v508_v54, %v376_v61 }
 0x21b   :  { %v1907_v5 = vpop.f32.mrf.mxu1  ;;  %1948 = vmatpush3.bf16.msra.mxu0 %v2209_v53 }
 0x21c   :  { %v557_v6 = vpack.c.bf16 %v547_v2, %v546_v1  ;;  %v545_v7 = vmax.f32 %v509_v3, 0.0  ;;  %v530_v39 = vadd.f32 %v1907_v5, %v381_v35  ;;  %1949 = vmatprep.subr.bf16.mxu0 %v2210_v46 }
 0x21d   :  { %v521_v56 = vpop.f32.mrf.mxu1 }
 0x21e   :  { %v556_v52 = vpack.c.bf16 %v545_v7, %v544_v50  ;;  %v522_v11 = vadd.f32 %v521_v56, %v379_v8  ;;  %v550_v16 = vmax.f32 %v530_v39, 0.0 }
 0x21f   :  { %v1908_v10 = vpop.f32.mrf.mxu1  ;;  %1950 = vmatpush3.bf16.msra.mxu0 %v2210_v46 }
 0x220   :  { %v533_v12 = vadd.f32 %v1908_v10, %v382_v9  ;;  %1933 = vmatprep.mubr.bf16.mxu1 %v556_v52  ;;  %v548_v15 = vmax.f32 %v522_v11, 0.0  ;;  %1951 = vmatprep.subr.bf16.mxu0 %v2211_v31 }
 0x221   :  { %v524_v32 = vpop.f32.mrf.mxu1  ;;  %1934 = vmatmul.mubr.bf16.gmra.mxu1 %v557_v6 }
 0x222   :  { %v525_v13 = vadd.f32 %v524_v32, %v380_v28  ;;  %v551_v14 = vmax.f32 %v533_v12, 0.0 }
 0x223   :  { %1952 = vmatpush3.bf16.msra.mxu0 %v2211_v31 }
 0x224   :  { %v549_v58 = vmax.f32 %v525_v13, 0.0  ;;  %v559_v29 = vpack.c.bf16 %v551_v14, %v550_v16  ;;  %1953 = vmatprep.subr.bf16.mxu0 %v2212_v33 }
 0x226   :  { %v558_v26 = vpack.c.bf16 %v549_v58, %v548_v15 }
 0x227   :  { %1954 = vmatpush3.bf16.msra.mxu0 %v2212_v33 }
 0x228   :  { %1937 = vmatprep.mubr.bf16.mxu1 %v558_v26  ;;  %1955 = vmatprep.subr.bf16.mxu0 %v2213_v37  ;;  %v2219_v26 = vld [vmem:[%s2829_s9 + $0x10] sm:$0xff]  }
 0x229   :  { %1938 = vmatmul.mubr.bf16.gmra.mxu1 %v559_v29 }
 0x22a   :  { %1989 = vmatprep.mubr.bf16.mxu1 %v2415_v25 }
 0x22b   :  { %1956 = vmatpush3.bf16.msra.mxu0 %v2213_v37 }
 0x22c   :  { %2005 = vmatprep.subr.bf16.mxu0 %v2214_v38 }
 0x22e   :  { %1958 = vmatmul.mubr.bf16.vlgmr.msra.gmra.mxu0 %v2372_v18  ;;  %v2215_v18 = vld [vmem:[%s2829_s9 + $0x30] sm:$0xff]  }
 0x22f   :  { %1961 = vmatprep.mubr.bf16.mxu0 %v2378_v19  ;;  %v2216_v19 = vld [vmem:[%s2829_s9 + $0x28] sm:$0xff]   ;;  %2006 = vmatpush3.bf16.msra.mxu0 %v2214_v38  ;;  %v2627_v38 = vld [vmem:[%s2831_s8] ss:$0 sm:$0xff] }
 0x230   :  { %2007 = vmatprep.subr.bf16.mxu0 %v2215_v18 }
 0x233   :  { %2008 = vmatpush3.bf16.msra.mxu0 %v2215_v18 }
 0x234   :  { %2009 = vmatprep.subr.bf16.mxu0 %v2216_v19 }
 0x236   :  { %1962 = vmatmul.mubr.bf16.gmra.mxu0 %v2384_v20  ;;  %v2217_v20 = vld [vmem:[%s2829_s9 + $0x20] sm:$0xff]  }
 0x237   :  { %1965 = vmatprep.mubr.bf16.mxu0 %v2390_v21  ;;  %2010 = vmatpush3.bf16.msra.mxu0 %v2216_v19 }
 0x238   :  { %2011 = vmatprep.subr.bf16.mxu0 %v2217_v20 }
 0x23b   :  { %2012 = vmatpush3.bf16.msra.mxu0 %v2217_v20 }
 0x23e   :  { %1966 = vmatmul.mubr.bf16.gmra.mxu0 %v2396_v22  ;;  %v2218_v22 = vld [vmem:[%s2829_s9 + $0x18] sm:$0xff]  }
 0x23f   :  { %1969 = vmatprep.mubr.bf16.mxu0 %v2402_v23  ;;  %2013 = vmatprep.subr.bf16.mxu0 %v2218_v22 }
 0x240   :  { %2014 = vmatpush3.bf16.msra.mxu0 %v2218_v22 }
 0x241   :  { %2015 = vmatprep.subr.bf16.mxu0 %v2219_v26 }
 0x244   :  { %2016 = vmatpush3.bf16.msra.mxu0 %v2219_v26 }
 0x246   :  { %1970 = vmatmul.mubr.bf16.gmra.mxu0 %v2408_v24 }
 0x2d1   :  { %v1927_v21 = vpop.f32.mrf.mxu1 }
 0x2d2   :  { %v674_v13 = vadd.f32 %v1927_v21, %v1697_v63 }
 0x2d3   :  { %v665_v23 = vpop.f32.mrf.mxu1 }
 0x2d4   :  { %v666_v58 = vadd.f32 %v1697_v63, %v665_v23 }
 0x2d5   :  { %v1928_v24 = vpop.f32.mrf.mxu1 }
 0x2d6   :  { %v677_v39 = vadd.f32 %v1928_v24, %v1697_v63 }
 0x2d7   :  { %v668_v42 = vpop.f32.mrf.mxu1 }
 0x2d8   :  { %v897_v14 = vpack.c.bf16 %v677_v39, %v674_v13  ;;  %v669_v15 = vadd.f32 %v1697_v63, %v668_v42 }
 0x2d9   :  { %v1931_v45 = vpop.f32.mrf.mxu1 }
 0x2da   :  { %v690_v10 = vadd.f32 %v1931_v45, %v1697_v63  ;;  %v896_v16 = vpack.c.bf16 %v669_v15, %v666_v58 }
 0x2db   :  { %v681_v48 = vpop.f32.mrf.mxu1 }
 0x2dc   :  { %v682_v12 = vadd.f32 %v1697_v63, %v681_v48 }
 0x2dd   :  { %v1932_v47 = vpop.f32.mrf.mxu1 }
 0x2de   :  { %v693_v52 = vadd.f32 %v1932_v47, %v1697_v63 }
 0x2df   :  { %v684_v49 = vpop.f32.mrf.mxu1 }
 0x2e0   :  { %v899_v28 = vpack.c.bf16 %v693_v52, %v690_v10  ;;  %v685_v11 = vadd.f32 %v1697_v63, %v684_v49 }
 0x2e1   :  { %v1935_v51 = vpop.f32.mrf.mxu1 }
 0x2e2   :  { %v706_v7 = vadd.f32 %v1935_v51, %v1697_v63  ;;  %v898_v32 = vpack.c.bf16 %v685_v11, %v682_v12 }
 0x2e3   :  { %v697_v44 = vpop.f32.mrf.mxu1 }
 0x2e4   :  { %v698_v9 = vadd.f32 %v1697_v63, %v697_v44 }
 0x2e5   :  { %v1936_v55 = vpop.f32.mrf.mxu1 }
 0x2e6   :  { %v709_v50 = vadd.f32 %v1936_v55, %v1697_v63 }
 0x2e7   :  { %v700_v57 = vpop.f32.mrf.mxu1 }
 0x2e8   :  { %v901_v56 = vpack.c.bf16 %v709_v50, %v706_v7  ;;  %v701_v8 = vadd.f32 %v1697_v63, %v700_v57 }
 0x2e9   :  { %v1939_v59 = vpop.f32.mrf.mxu1 }
 0x2ea   :  { %v722_v54 = vadd.f32 %v1939_v59, %v1697_v63  ;;  %v900_v35 = vpack.c.bf16 %v701_v8, %v698_v9 }
 0x2eb   :  { %v713_v61 = vpop.f32.mrf.mxu1 }
 0x2ec   :  { %v714_v3 = vadd.f32 %v1697_v63, %v713_v61 }
 0x2ed   :  { %v1940_v0 = vpop.f32.mrf.mxu1 }
 0x2ee   :  { %v725_v1 = vadd.f32 %v1940_v0, %v1697_v63  ;;  %v1959_v29 = vpop.f32.mrf.mxu0 }
 0x2ef   :  { %v716_v2 = vpop.f32.mrf.mxu1  ;;  %v842_v19 = vadd.f32 %v1959_v29, %v2627_v38 }
 0x2f0   :  { %v903_v4 = vpack.c.bf16 %v725_v1, %v722_v54  ;;  %v717_v5 = vadd.f32 %v1697_v63, %v716_v2 }
 0x2f2   :  { %v902_v6 = vpack.c.bf16 %v717_v5, %v714_v3  ;;  %1973 = vmatprep.subr.bf16.mxu1 %v903_v4 }
 0x2f3   :  { %1974 = vmatpush3.bf16.msra.mxu1 %v903_v4 }
 0x2f4   :  { %1975 = vmatprep.subr.bf16.mxu1 %v902_v6 }
 0x2f7   :  { %1976 = vmatpush3.bf16.msra.mxu1 %v902_v6 }
 0x2f8   :  { %1977 = vmatprep.subr.bf16.mxu1 %v901_v56 }
 0x2fb   :  { %1978 = vmatpush3.bf16.msra.mxu1 %v901_v56 }
 0x2fc   :  { %1979 = vmatprep.subr.bf16.mxu1 %v900_v35 }
 0x2ff   :  { %1980 = vmatpush3.bf16.msra.mxu1 %v900_v35 }
 0x300   :  { %1981 = vmatprep.subr.bf16.mxu1 %v899_v28 }
 0x303   :  { %1982 = vmatpush3.bf16.msra.mxu1 %v899_v28 }
 0x304   :  { %1983 = vmatprep.subr.bf16.mxu1 %v898_v32 }
 0x307   :  { %1984 = vmatpush3.bf16.msra.mxu1 %v898_v32 }
 0x308   :  { %1985 = vmatprep.subr.bf16.mxu1 %v897_v14 }
 0x30b   :  { %1986 = vmatpush3.bf16.msra.mxu1 %v897_v14 }
 0x30c   :  { %1987 = vmatprep.subr.bf16.mxu1 %v896_v16 }
 0x30f   :  { %1988 = vmatpush3.bf16.msra.mxu1 %v896_v16 }
 0x312   :  { %1990 = vmatmul.mubr.bf16.vlgmr.msra.gmra.mxu1 %v2460_v30  ;;  %v2220_v30 = vld [vmem:[%s2829_s9 + $0x8] sm:$0xff]  }
 0x313   :  { %1993 = vmatprep.mubr.bf16.mxu1 %v2466_v27  ;;  %2017 = vmatprep.subr.bf16.mxu0 %v2220_v30  ;;  %v2221_v27 = vld [vmem:[%s2829_s9] sm:$0xff]  }
 0x314   :  { %2018 = vmatpush3.bf16.msra.mxu0 %v2220_v30 }
 0x315   :  { %2019 = vmatprep.subr.bf16.mxu0 %v2221_v27 }
 0x318   :  { %2020 = vmatpush3.bf16.msra.mxu0 %v2221_v27 }
 0x31a   :  { %1994 = vmatmul.mubr.bf16.gmra.mxu1 %v2479_v34 }
 0x31b   :  { %1997 = vmatprep.mubr.bf16.mxu1 %v2484_v36 }
 0x322   :  { %1998 = vmatmul.mubr.bf16.gmra.mxu1 %v2497_v40 }
 0x323   :  { %2001 = vmatprep.mubr.bf16.mxu1 %v2502_v41 }
 0x32a   :  { %2002 = vmatmul.mubr.bf16.gmra.mxu1 %v2509_v43 }
 0x32b   :  { %2053 = vmatprep.mubr.bf16.mxu1 %v2366_v17  ;;  %v833_v17 = vpop.f32.mrf.mxu0 }
 0x32c   :  { %v834_v22 = vadd.f32 %v2627_v38, %v833_v17 }
 0x32d   :  { %v1960_v60 = vpop.f32.mrf.mxu0 }
 0x32e   :  { %v845_v23 = vadd.f32 %v1960_v60, %v2627_v38 }
 0x32f   :  { %v836_v62 = vpop.f32.mrf.mxu0 }
 0x330   :  { %v837_v42 = vadd.f32 %v2627_v38, %v836_v62 }
 0x331   :  { %v1963_v53 = vpop.f32.mrf.mxu0 }
 0x332   :  { %v858_v63 = vadd.f32 %v1963_v53, %v2627_v38 }
 0x333   :  { %v849_v46 = vpop.f32.mrf.mxu0 }
 0x334   :  { %v850_v2 = vadd.f32 %v2627_v38, %v849_v46 }
 0x335   :  { %v1964_v31 = vpop.f32.mrf.mxu0 }
 0x336   :  { %v861_v3 = vadd.f32 %v1964_v31, %v2627_v38 }
 0x337   :  { %v852_v33 = vpop.f32.mrf.mxu0 }
 0x338   :  { %v853_v6 = vadd.f32 %v2627_v38, %v852_v33 }
 0x339   :  { %v1967_v37 = vpop.f32.mrf.mxu0 }
 0x33a   :  { %v874_v39 = vadd.f32 %v1967_v37, %v2627_v38 }
 0x33b   :  { %v865_v21 = vpop.f32.mrf.mxu0 }
 0x33c   :  { %v866_v15 = vadd.f32 %v2627_v38, %v865_v21 }
 0x33d   :  { %v1968_v51 = vpop.f32.mrf.mxu0 }
 0x33e   :  { %v877_v58 = vadd.f32 %v1968_v51, %v2627_v38 }
 0x33f   :  { %v868_v1 = vpop.f32.mrf.mxu0 }
 0x340   :  { %v869_v27 = vadd.f32 %v2627_v38, %v868_v1 }
 0x341   :  { %v1971_v52 = vpop.f32.mrf.mxu0 }
 0x343   :  { %v881_v13 = vpop.f32.mrf.mxu0 }
 0x345   :  { %v1972_v62 = vpop.f32.mrf.mxu0 }
 0x347   :  { %v884_v21 = vpop.f32.mrf.mxu0 }
 0x3d2   :  { %v1991_v18 = vpop.f32.mrf.mxu1 }
 0x3d3   :  { %v947_v47 = vadd.f32 %v1991_v18, %v842_v19  ;;  %v890_v19 = vadd.f32 %v1971_v52, %v2627_v38  ;;  %v2234_v52 = vld [vmem:[%s2823_s0 + $0x28] sm:$0xff]  }
 0x3d4   :  { %v938_v20 = vpop.f32.mrf.mxu1 }
 0x3d5   :  { %v939_v45 = vadd.f32 %v938_v20, %v834_v22  ;;  %v1003_v0 = vmax.f32 %v947_v47, 0.0  ;;  %v885_v47 = vadd.f32 %v2627_v38, %v884_v21  ;;  %v1715_v21 = vld [vmem:[%s2834_s10] ss:$0 sm:$0xff] }
 0x3d6   :  { %v1992_v24 = vpop.f32.mrf.mxu1 }
 0x3d7   :  { %v950_v48 = vadd.f32 %v1992_v24, %v845_v23  ;;  %v1001_v59 = vmax.f32 %v939_v45, 0.0  ;;  %v882_v23 = vadd.f32 %v2627_v38, %v881_v13  ;;  %v893_v24 = vadd.f32 %v1972_v62, %v2627_v38  ;;  %v2222_v38 = vld [vmem:[%s2832_s11 + $0x38] sm:$0xff]   ;;  %v1492_v13 = vld [vmem:[%s2833_s13 + $0x50] sm:$0xff] }
 0x3d8   :  { %v941_v49 = vpop.f32.mrf.mxu1  ;;  %2037 = vmatprep.subr.bf16.mxu1 %v2222_v38 }
 0x3d9   :  { %v942_v44 = vadd.f32 %v941_v49, %v837_v42  ;;  %v1004_v55 = vmax.f32 %v950_v48, 0.0  ;;  %2038 = vmatpush3.bf16.msra.mxu1 %v2222_v38 }
 0x3da   :  { %v1995_v57 = vpop.f32.mrf.mxu1 }
 0x3db   :  { %v1002_v61 = vmax.f32 %v942_v44, 0.0  ;;  %v1018_v5 = vpack.c.bf16 %v1004_v55, %v1003_v0  ;;  %v963_v8 = vadd.f32 %v1995_v57, %v858_v63 }
 0x3dc   :  { %v954_v54 = vpop.f32.mrf.mxu1 }
 0x3dd   :  { %v1017_v4 = vpack.c.bf16 %v1002_v61, %v1001_v59  ;;  %v955_v7 = vadd.f32 %v954_v54, %v850_v2  ;;  %v1007_v32 = vmax.f32 %v963_v8, 0.0  ;;  %v2223_v2 = vld [vmem:[%s2832_s11 + $0x30] sm:$0xff]   ;;  %v2232_v8 = vld [vmem:[%s2823_s0 + $0x18] sm:$0xff]  }
 0x3de   :  { %v1996_v50 = vpop.f32.mrf.mxu1  ;;  %2039 = vmatprep.subr.bf16.mxu1 %v2223_v2 }
 0x3df   :  { %v966_v56 = vadd.f32 %v1996_v50, %v861_v3  ;;  %2021 = vmatprep.mubr.bf16.mxu0 %v1017_v4  ;;  %v1005_v11 = vmax.f32 %v955_v7, 0.0  ;;  %2040 = vmatpush3.bf16.msra.mxu1 %v2223_v2  ;;  %v2224_v3 = vld [vmem:[%s2832_s11 + $0x28] sm:$0xff]   ;;  %v2226_v4 = vld [vmem:[%s2832_s11 + $0x18] sm:$0xff]  }
 0x3e0   :  { %v957_v9 = vpop.f32.mrf.mxu1  ;;  %2022 = vmatmul.mubr.bf16.vlgmr.msra.gmra.mxu0 %v1018_v5  ;;  %2041 = vmatprep.subr.bf16.mxu1 %v2224_v3  ;;  %v2227_v5 = vld [vmem:[%s2832_s11 + $0x10] sm:$0xff]   ;;  %v2228_v50 = vld [vmem:[%s2832_s11 + $0x8] sm:$0xff]  }
 0x3e1   :  { %v958_v35 = vadd.f32 %v957_v9, %v853_v6  ;;  %v1008_v10 = vmax.f32 %v966_v56, 0.0  ;;  %v2229_v6 = vld [vmem:[%s2832_s11] sm:$0xff]   ;;  %v2230_v7 = vld [vmem:[%s2823_s0 + $0x8] sm:$0xff]   ;;  %v2231_v56 = vld [vmem:[%s2823_s0 + $0x10] sm:$0xff]  }
 0x3e2   :  { %v1999_v28 = vpop.f32.mrf.mxu1  ;;  %v2233_v9 = vld [vmem:[%s2823_s0 + $0x20] sm:$0xff]  }
 0x3e3   :  { %v1006_v12 = vmax.f32 %v958_v35, 0.0  ;;  %v1020_v26 = vpack.c.bf16 %v1008_v10, %v1007_v32  ;;  %v979_v60 = vadd.f32 %v1999_v28, %v874_v39  ;;  %2042 = vmatpush3.bf16.msra.mxu1 %v2224_v3  ;;  %v2235_v35 = vld [vmem:[%s2823_s0 + $0x30] sm:$0xff]   ;;  %v2236_v10 = vld [vmem:[%s2823_s0 + $0x38] sm:$0xff]   ;;  %v1494_v39 = vld [vmem:[%s2833_s13 + $0x60] sm:$0xff] }
 0x3e4   :  { %v970_v14 = vpop.f32.mrf.mxu1  ;;  %v1497_v28 = vld [vmem:[%s2833_s13 + $0x78] sm:$0xff] }
 0x3e5   :  { %v1019_v16 = vpack.c.bf16 %v1006_v12, %v1005_v11  ;;  %v971_v29 = vadd.f32 %v970_v14, %v866_v15  ;;  %v1011_v20 = vmax.f32 %v979_v60, 0.0  ;;  %v1496_v11 = vld [vmem:[%s2833_s13 + $0x70] sm:$0xff]  ;;  %v1495_v12 = vld [vmem:[%s2833_s13 + $0x68] sm:$0xff]  ;;  %v1493_v32 = vld [vmem:[%s2833_s13 + $0x58] sm:$0xff] }
 0x3e6   :  { %v2000_v30 = vpop.f32.mrf.mxu1  ;;  %v1491_v14 = vld [vmem:[%s2833_s13 + $0x48] sm:$0xff]  ;;  %v1490_v15 = vld [vmem:[%s2833_s13 + $0x40] sm:$0xff] }
 0x3e7   :  { %v982_v17 = vadd.f32 %v2000_v30, %v877_v58  ;;  %2025 = vmatprep.mubr.bf16.mxu0 %v1019_v16  ;;  %v1009_v37 = vmax.f32 %v971_v29, 0.0  ;;  %v1489_v58 = vld [vmem:[%s2833_s13 + $0x38] sm:$0xff]  ;;  %v1488_v16 = vld [vmem:[%s2833_s13 + $0x30] sm:$0xff]  ;;  %v1487_v30 = vld [vmem:[%s2833_s13 + $0x28] sm:$0xff] }
 0x3e8   :  { %v973_v53 = vpop.f32.mrf.mxu1  ;;  %2026 = vmatmul.mubr.bf16.gmra.mxu0 %v1020_v26 }
 0x3e9   :  { %v974_v46 = vadd.f32 %v973_v53, %v869_v27  ;;  %v1012_v31 = vmax.f32 %v982_v17, 0.0 }
 0x3ea   :  { %v2003_v33 = vpop.f32.mrf.mxu1 }
 0x3eb   :  { %v1010_v18 = vmax.f32 %v974_v46, 0.0  ;;  %v1022_v45 = vpack.c.bf16 %v1012_v31, %v1011_v20  ;;  %v995_v44 = vadd.f32 %v2003_v33, %v890_v19 }
 0x3ec   :  { %v986_v22 = vpop.f32.mrf.mxu1 }
 0x3ed   :  { %v1021_v42 = vpack.c.bf16 %v1010_v18, %v1009_v37  ;;  %v987_v49 = vadd.f32 %v986_v22, %v882_v23  ;;  %v1015_v0 = vmax.f32 %v995_v44, 0.0 }
 0x3ee   :  { %v2004_v48 = vpop.f32.mrf.mxu1 }
 0x3ef   :  { %v998_v51 = vadd.f32 %v2004_v48, %v893_v24  ;;  %2029 = vmatprep.mubr.bf16.mxu0 %v1021_v42  ;;  %v1013_v61 = vmax.f32 %v987_v49, 0.0 }
 0x3f0   :  { %v989_v55 = vpop.f32.mrf.mxu1  ;;  %2030 = vmatmul.mubr.bf16.gmra.mxu0 %v1022_v45 }
 0x3f1   :  { %v990_v57 = vadd.f32 %v989_v55, %v885_v47  ;;  %v1016_v59 = vmax.f32 %v998_v51, 0.0 }
 0x3f3   :  { %v1014_v63 = vmax.f32 %v990_v57, 0.0  ;;  %v1024_v1 = vpack.c.bf16 %v1016_v59, %v1015_v0 }
 0x3f5   :  { %v1023_v54 = vpack.c.bf16 %v1014_v63, %v1013_v61 }
 0x3f7   :  { %2033 = vmatprep.mubr.bf16.mxu0 %v1023_v54 }
 0x3f8   :  { %2034 = vmatmul.mubr.bf16.gmra.mxu0 %v1024_v1 }
 0x3f9   :  { %2085 = vmatprep.mubr.bf16.mxu0 %v2415_v25  ;;  %v2225_v25 = vld [vmem:[%s2832_s11 + $0x20] sm:$0xff]  }
 0x3fa   :  { %2043 = vmatprep.subr.bf16.mxu1 %v2225_v25 }
 0x3fb   :  { %2044 = vmatpush3.bf16.msra.mxu1 %v2225_v25 }
 0x3fc   :  { %2045 = vmatprep.subr.bf16.mxu1 %v2226_v4 }
 0x3ff   :  { %2046 = vmatpush3.bf16.msra.mxu1 %v2226_v4 }
 0x400   :  { %2047 = vmatprep.subr.bf16.mxu1 %v2227_v5 }
 0x403   :  { %2048 = vmatpush3.bf16.msra.mxu1 %v2227_v5 }
 0x404   :  { %2049 = vmatprep.subr.bf16.mxu1 %v2228_v50 }
 0x407   :  { %2050 = vmatpush3.bf16.msra.mxu1 %v2228_v50 }
 0x408   :  { %2051 = vmatprep.subr.bf16.mxu1 %v2229_v6 }
 0x40b   :  { %2052 = vmatpush3.bf16.msra.mxu1 %v2229_v6 }
 0x40c   :  { %2101 = vmatprep.subr.mxu1 %v1497_v28 }
 0x40e   :  { %2054 = vmatmul.mubr.bf16.vlgmr.msra.gmra.mxu1 %v2230_v7  ;;  %v2237_v7 = vld [vmem:[%s2824_s1 + $0x8] sm:$0xff]  }
 0x40f   :  { %2057 = vmatprep.mubr.bf16.mxu1 %v2231_v56  ;;  %2102 = vmatpush3.msra.mxu1 %v1497_v28  ;;  %v2238_v56 = vld [vmem:[%s2824_s1 + $0x10] sm:$0xff]  }
 0x410   :  { %2103 = vmatprep.subr.mxu1 %v1496_v11 }
 0x411   :  { %2104 = vmatpush3.msra.mxu1 %v1496_v11 }
 0x412   :  { %2105 = vmatprep.subr.mxu1 %v1495_v12 }
 0x413   :  { %2106 = vmatpush3.msra.mxu1 %v1495_v12 }
 0x414   :  { %2107 = vmatprep.subr.mxu1 %v1494_v39 }
 0x415   :  { %2108 = vmatpush3.msra.mxu1 %v1494_v39  ;;  %v2756_v39 = vld [vmem:[%s2835_s12] ss:$0 sm:$0xff] }
 0x416   :  { %2058 = vmatmul.mubr.bf16.gmra.mxu1 %v2232_v8  ;;  %2109 = vmatprep.subr.mxu1 %v1493_v32  ;;  %v1486_v8 = vld [vmem:[%s2833_s13 + $0x20] sm:$0xff] }
 0x417   :  { %2061 = vmatprep.mubr.bf16.mxu1 %v2233_v9  ;;  %2110 = vmatpush3.msra.mxu1 %v1493_v32  ;;  %v1485_v9 = vld [vmem:[%s2833_s13 + $0x18] sm:$0xff] }
 0x418   :  { %2111 = vmatprep.subr.mxu1 %v1492_v13 }
 0x419   :  { %2112 = vmatpush3.msra.mxu1 %v1492_v13 }
 0x41a   :  { %2113 = vmatprep.subr.mxu1 %v1491_v14 }
 0x41b   :  { %2114 = vmatpush3.msra.mxu1 %v1491_v14 }
 0x41c   :  { %2115 = vmatprep.subr.mxu1 %v1490_v15 }
 0x41d   :  { %2116 = vmatpush3.msra.mxu1 %v1490_v15 }
 0x41e   :  { %2062 = vmatmul.mubr.bf16.gmra.mxu1 %v2234_v52  ;;  %2117 = vmatprep.subr.mxu1 %v1489_v58 }
 0x41f   :  { %2065 = vmatprep.mubr.bf16.mxu1 %v2235_v35  ;;  %2118 = vmatpush3.msra.mxu1 %v1489_v58 }
 0x420   :  { %2119 = vmatprep.subr.mxu1 %v1488_v16 }
 0x421   :  { %2120 = vmatpush3.msra.mxu1 %v1488_v16 }
 0x422   :  { %2121 = vmatprep.subr.mxu1 %v1487_v30 }
 0x423   :  { %2122 = vmatpush3.msra.mxu1 %v1487_v30 }
 0x424   :  { %2123 = vmatprep.subr.mxu1 %v1486_v8 }
 0x425   :  { %2124 = vmatpush3.msra.mxu1 %v1486_v8 }
 0x426   :  { %2066 = vmatmul.mubr.bf16.gmra.mxu1 %v2236_v10  ;;  %2125 = vmatprep.subr.mxu1 %v1485_v9 }
 0x427   :  { %2126 = vmatpush3.msra.mxu1 %v1485_v9 }
 0x4a0   :  { %v2023_v26 = vpop.f32.mrf.mxu0 }
 0x4a1   :  { %v1139_v25 = vadd.f32 %v2023_v26, %v1715_v21 }
 0x4a2   :  { %v1130_v27 = vpop.f32.mrf.mxu0 }
 0x4a3   :  { %v1131_v50 = vadd.f32 %v1715_v21, %v1130_v27 }
 0x4a4   :  { %v2024_v29 = vpop.f32.mrf.mxu0 }
 0x4a5   :  { %v1142_v2 = vadd.f32 %v2024_v29, %v1715_v21 }
 0x4a6   :  { %v1133_v17 = vpop.f32.mrf.mxu0 }
 0x4a7   :  { %v1362_v4 = vpack.c.bf16 %v1142_v2, %v1139_v25  ;;  %v1134_v5 = vadd.f32 %v1715_v21, %v1133_v17 }
 0x4a8   :  { %v2027_v60 = vpop.f32.mrf.mxu0 }
 0x4a9   :  { %v1155_v0 = vadd.f32 %v2027_v60, %v1715_v21  ;;  %v1361_v6 = vpack.c.bf16 %v1134_v5, %v1131_v50 }
 0x4aa   :  { %v1146_v62 = vpop.f32.mrf.mxu0 }
 0x4ab   :  { %v1147_v38 = vadd.f32 %v1715_v21, %v1146_v62 }
 0x4ac   :  { %v2028_v53 = vpop.f32.mrf.mxu0 }
 0x4ad   :  { %v1158_v61 = vadd.f32 %v2028_v53, %v1715_v21 }
 0x4ae   :  { %v1149_v46 = vpop.f32.mrf.mxu0 }
 0x4af   :  { %v1364_v54 = vpack.c.bf16 %v1158_v61, %v1155_v0  ;;  %v1150_v1 = vadd.f32 %v1715_v21, %v1149_v46 }
 0x4b0   :  { %v2031_v31 = vpop.f32.mrf.mxu0 }
 0x4b1   :  { %v1171_v44 = vadd.f32 %v2031_v31, %v1715_v21  ;;  %v1363_v3 = vpack.c.bf16 %v1150_v1, %v1147_v38 }
 0x4b2   :  { %v1162_v33 = vpop.f32.mrf.mxu0 }
 0x4b3   :  { %v1163_v59 = vadd.f32 %v1715_v21, %v1162_v33 }
 0x4b4   :  { %v2032_v37 = vpop.f32.mrf.mxu0 }
 0x4b5   :  { %v1174_v49 = vadd.f32 %v2032_v37, %v1715_v21 }
 0x4b6   :  { %v1165_v18 = vpop.f32.mrf.mxu0 }
 0x4b7   :  { %v1366_v55 = vpack.c.bf16 %v1174_v49, %v1171_v44  ;;  %v1166_v57 = vadd.f32 %v1715_v21, %v1165_v18 }
 0x4b8   :  { %v2035_v19 = vpop.f32.mrf.mxu0 }
 0x4b9   :  { %v1187_v23 = vadd.f32 %v2035_v19, %v1715_v21  ;;  %v1365_v63 = vpack.c.bf16 %v1166_v57, %v1163_v59 }
 0x4ba   :  { %v1178_v20 = vpop.f32.mrf.mxu0 }
 0x4bb   :  { %v1179_v45 = vadd.f32 %v1715_v21, %v1178_v20 }
 0x4bc   :  { %v2036_v22 = vpop.f32.mrf.mxu0 }
 0x4bd   :  { %v1190_v24 = vadd.f32 %v2036_v22, %v1715_v21 }
 0x4be   :  { %v1181_v42 = vpop.f32.mrf.mxu0 }
 0x4bf   :  { %v1368_v48 = vpack.c.bf16 %v1190_v24, %v1187_v23  ;;  %v1182_v47 = vadd.f32 %v1715_v21, %v1181_v42 }
 0x4c1   :  { %v1367_v51 = vpack.c.bf16 %v1182_v47, %v1179_v45  ;;  %2069 = vmatprep.subr.bf16.mxu0 %v1368_v48 }
 0x4c2   :  { %2070 = vmatpush3.bf16.msra.mxu0 %v1368_v48 }
 0x4c3   :  { %2071 = vmatprep.subr.bf16.mxu0 %v1367_v51 }
 0x4c6   :  { %2072 = vmatpush3.bf16.msra.mxu0 %v1367_v51 }
 0x4c7   :  { %2073 = vmatprep.subr.bf16.mxu0 %v1366_v55 }
 0x4ca   :  { %2074 = vmatpush3.bf16.msra.mxu0 %v1366_v55 }
 0x4cb   :  { %2075 = vmatprep.subr.bf16.mxu0 %v1365_v63 }
 0x4ce   :  { %2076 = vmatpush3.bf16.msra.mxu0 %v1365_v63 }
 0x4cf   :  { %2077 = vmatprep.subr.bf16.mxu0 %v1364_v54 }
 0x4d2   :  { %2078 = vmatpush3.bf16.msra.mxu0 %v1364_v54 }
 0x4d3   :  { %2079 = vmatprep.subr.bf16.mxu0 %v1363_v3 }
 0x4d6   :  { %2080 = vmatpush3.bf16.msra.mxu0 %v1363_v3 }
 0x4d7   :  { %2081 = vmatprep.subr.bf16.mxu0 %v1362_v4 }
 0x4da   :  { %2082 = vmatpush3.bf16.msra.mxu0 %v1362_v4 }
 0x4db   :  { %2083 = vmatprep.subr.bf16.mxu0 %v1361_v6 }
 0x4de   :  { %2084 = vmatpush3.bf16.msra.mxu0 %v1361_v6 }
 0x4e1   :  { %2086 = vmatmul.mubr.bf16.vlgmr.msra.gmra.mxu0 %v2237_v7 }
 0x4e2   :  { %2089 = vmatprep.mubr.bf16.mxu0 %v2238_v56 }
 0x4e9   :  { %2090 = vmatmul.mubr.bf16.gmra.mxu0 %v2479_v34  ;;  %v1484_v34 = vld [vmem:[%s2833_s13 + $0x10] sm:$0xff] }
 0x4ea   :  { %2093 = vmatprep.mubr.bf16.mxu0 %v2484_v36  ;;  %2127 = vmatprep.subr.mxu1 %v1484_v34  ;;  %v1483_v36 = vld [vmem:[%s2833_s13 + $0x8] sm:$0xff] }
 0x4eb   :  { %2128 = vmatpush3.msra.mxu1 %v1484_v34 }
 0x4ec   :  { %2129 = vmatprep.subr.mxu1 %v1483_v36 }
 0x4ed   :  { %2130 = vmatpush3.msra.mxu1 %v1483_v36 }
 0x4f1   :  { %2094 = vmatmul.mubr.bf16.gmra.mxu0 %v2497_v40  ;;  %v1482_v40 = vld [vmem:[%s2833_s13] sm:$0xff] }
 0x4f2   :  { %2097 = vmatprep.mubr.bf16.mxu0 %v2502_v41  ;;  %2131 = vmatprep.subr.mxu1 %v1482_v40  ;;  %v2055_v41 = vpop.f32.mrf.mxu1 }
 0x4f3   :  { %2132 = vmatpush3.msra.mxu1 %v1482_v40  ;;  %v1307_v15 = vadd.f32 %v2055_v41, %v2756_v39 }
 0x4f9   :  { %2098 = vmatmul.mubr.bf16.gmra.mxu0 %v2509_v43  ;;  %v1298_v43 = vpop.f32.mrf.mxu1 }
 0x4fa   :  { %v1299_v14 = vadd.f32 %v2756_v39, %v1298_v43 }
 0x4fb   :  { %v2056_v52 = vpop.f32.mrf.mxu1 }
 0x4fc   :  { %v1310_v53 = vadd.f32 %v2056_v52, %v2756_v39 }
 0x4fd   :  { %v1301_v35 = vpop.f32.mrf.mxu1 }
 0x4fe   :  { %v1302_v27 = vadd.f32 %v2756_v39, %v1301_v35 }
 0x4ff   :  { %v2059_v10 = vpop.f32.mrf.mxu1 }
 0x500   :  { %v1323_v20 = vadd.f32 %v2059_v10, %v2756_v39 }
 0x501   :  { %v1314_v28 = vpop.f32.mrf.mxu1 }
 0x502   :  { %v1315_v33 = vadd.f32 %v2756_v39, %v1314_v28 }
 0x503   :  { %v2060_v11 = vpop.f32.mrf.mxu1 }
 0x504   :  { %v1326_v44 = vadd.f32 %v2060_v11, %v2756_v39 }
 0x505   :  { %v1317_v12 = vpop.f32.mrf.mxu1 }
 0x506   :  { %v1318_v45 = vadd.f32 %v2756_v39, %v1317_v12 }
 0x507   :  { %v2063_v32 = vpop.f32.mrf.mxu1 }
 0x508   :  { %v1339_v54 = vadd.f32 %v2063_v32, %v2756_v39 }
 0x509   :  { %v1330_v16 = vpop.f32.mrf.mxu1 }
 0x50a   :  { %v1331_v59 = vadd.f32 %v2756_v39, %v1330_v16 }
 0x50b   :  { %v2064_v62 = vpop.f32.mrf.mxu1 }
 0x50c   :  { %v1342_v56 = vadd.f32 %v2064_v62, %v2756_v39 }
 0x50d   :  { %v1333_v22 = vpop.f32.mrf.mxu1 }
 0x50e   :  { %v1334_v4 = vadd.f32 %v2756_v39, %v1333_v22 }
 0x50f   :  { %v2067_v51 = vpop.f32.mrf.mxu1 }
 0x510   :  { %v1355_v43 = vadd.f32 %v2067_v51, %v2756_v39 }
 0x511   :  { %v1346_v38 = vpop.f32.mrf.mxu1 }
 0x512   :  { %v1347_v34 = vadd.f32 %v2756_v39, %v1346_v38 }
 0x513   :  { %v2068_v6 = vpop.f32.mrf.mxu1 }
 0x515   :  { %v1349_v52 = vpop.f32.mrf.mxu1 }
 0x516   :  { %v1350_v12 = vadd.f32 %v2756_v39, %v1349_v52 }
 0x5a1   :  { %v2087_v13 = vpop.f32.mrf.mxu0 }
 0x5a2   :  { %v1412_v17 = vadd.f32 %v2087_v13, %v1307_v15  ;;  %v1358_v15 = vadd.f32 %v2068_v6, %v2756_v39 }
 0x5a3   :  { %v1403_v58 = vpop.f32.mrf.mxu0 }
 0x5a4   :  { %v1404_v26 = vadd.f32 %v1403_v58, %v1299_v14  ;;  %v1468_v19 = vmax.f32 %v1412_v17, 0.0 }
 0x5a5   :  { %v2088_v30 = vpop.f32.mrf.mxu0 }
 0x5a6   :  { %v1466_v29 = vmax.f32 %v1404_v26, 0.0  ;;  %v1415_v37 = vadd.f32 %v2088_v30, %v1310_v53 }
 0x5a7   :  { %v1406_v60 = vpop.f32.mrf.mxu0 }
 0x5a8   :  { %v1407_v46 = vadd.f32 %v1406_v60, %v1302_v27  ;;  %2133 = vmatprep.mubr.f32.mxu1 %v1466_v29  ;;  %v1469_v42 = vmax.f32 %v1415_v37, 0.0 }
 0x5a9   :  { %v2091_v31 = vpop.f32.mrf.mxu0 }
 0x5aa   :  { %v1467_v18 = vmax.f32 %v1407_v46, 0.0  ;;  %v1428_v47 = vadd.f32 %v2091_v31, %v1323_v20 }
 0x5ab   :  { %v1419_v21 = vpop.f32.mrf.mxu0 }
 0x5ac   :  { %v1420_v23 = vadd.f32 %v1419_v21, %v1315_v33  ;;  %2134 = vmatmul.mubr.f32.vlgmr.msra.gmra.mxu1 %v1467_v18  ;;  %v1472_v0 = vmax.f32 %v1428_v47, 0.0 }
 0x5ad   :  { %v2092_v24 = vpop.f32.mrf.mxu0  ;;  %2136 = vmatprep.mubr.f32.mxu1 %v1468_v19 }
 0x5ae   :  { %v1470_v48 = vmax.f32 %v1420_v23, 0.0  ;;  %v1431_v61 = vadd.f32 %v2092_v24, %v1326_v44 }
 0x5af   :  { %v1422_v49 = vpop.f32.mrf.mxu0 }
 0x5b0   :  { %v1423_v55 = vadd.f32 %v1422_v49, %v1318_v45  ;;  %2137 = vmatmul.mubr.f32.gmra.mxu1 %v1469_v42  ;;  %v1473_v25 = vmax.f32 %v1431_v61, 0.0 }
 0x5b1   :  { %v2095_v57 = vpop.f32.mrf.mxu0  ;;  %2139 = vmatprep.mubr.f32.mxu1 %v1470_v48 }
 0x5b2   :  { %v1471_v63 = vmax.f32 %v1423_v55, 0.0  ;;  %v1444_v50 = vadd.f32 %v2095_v57, %v1339_v54 }
 0x5b3   :  { %v1435_v1 = vpop.f32.mrf.mxu0 }
 0x5b4   :  { %v1436_v2 = vadd.f32 %v1435_v1, %v1331_v59  ;;  %2140 = vmatmul.mubr.f32.gmra.mxu1 %v1471_v63  ;;  %v1476_v41 = vmax.f32 %v1444_v50, 0.0 }
 0x5b5   :  { %v2096_v3 = vpop.f32.mrf.mxu0  ;;  %2142 = vmatprep.mubr.f32.mxu1 %v1472_v0 }
 0x5b6   :  { %v1474_v5 = vmax.f32 %v1436_v2, 0.0  ;;  %v1447_v36 = vadd.f32 %v2096_v3, %v1342_v56 }
 0x5b7   :  { %v1438_v7 = vpop.f32.mrf.mxu0 }
 0x5b8   :  { %v1439_v8 = vadd.f32 %v1438_v7, %v1334_v4  ;;  %2143 = vmatmul.mubr.f32.gmra.mxu1 %v1473_v25  ;;  %v1477_v11 = vmax.f32 %v1447_v36, 0.0 }
 0x5b9   :  { %v2099_v9 = vpop.f32.mrf.mxu0  ;;  %2145 = vmatprep.mubr.f32.mxu1 %v1474_v5 }
 0x5ba   :  { %v1475_v40 = vmax.f32 %v1439_v8, 0.0  ;;  %v1460_v13 = vadd.f32 %v2099_v9, %v1355_v43 }
 0x5bb   :  { %v1451_v35 = vpop.f32.mrf.mxu0 }
 0x5bc   :  { %v1452_v10 = vadd.f32 %v1451_v35, %v1347_v34  ;;  %2146 = vmatmul.mubr.f32.gmra.mxu1 %v1475_v40  ;;  %v1480_v30 = vmax.f32 %v1460_v13, 0.0 }
 0x5bd   :  { %v2100_v28 = vpop.f32.mrf.mxu0  ;;  %2148 = vmatprep.mubr.f32.mxu1 %v1476_v41 }
 0x5be   :  { %v1478_v32 = vmax.f32 %v1452_v10, 0.0  ;;  %v1463_v16 = vadd.f32 %v2100_v28, %v1358_v15 }
 0x5bf   :  { %v1454_v14 = vpop.f32.mrf.mxu0 }
 0x5c0   :  { %v1455_v58 = vadd.f32 %v1454_v14, %v1350_v12  ;;  %2149 = vmatmul.mubr.f32.gmra.mxu1 %v1477_v11  ;;  %v1481_v27 = vmax.f32 %v1463_v16, 0.0 }
 0x5c1   :  { %2151 = vmatprep.mubr.f32.mxu1 %v1478_v32 }
 0x5c2   :  { %v1479_v26 = vmax.f32 %v1455_v58, 0.0 }
 0x5c4   :  { %2152 = vmatmul.mubr.f32.gmra.mxu1 %v1479_v26 }
 0x5c5   :  { %2154 = vmatprep.mubr.f32.mxu1 %v1480_v30 }
 0x5c8   :  { %2155 = vmatmul.mubr.f32.gmra.mxu1 %v1481_v27 }
 0x66c   :  { %v2135_v29 = vpop.f32.mrf.mxu1 }
 0x66d   :  { %1644 = vst [vmem:[%s2836_s14 + $0x8] sm:$0xff] %v2135_v29 }
 0x66e   :  { %v1564_v17 = vpop.f32.mrf.mxu1 }
 0x66f   :  { %1643 = vst [vmem:[%s2836_s14] sm:$0xff] %v1564_v17 }
 0x670   :  { %v2138_v39 = vpop.f32.mrf.mxu1 }
 0x671   :  { %1646 = vst [vmem:[%s2836_s14 + $0x18] sm:$0xff] %v2138_v39 }
 0x672   :  { %v1574_v60 = vpop.f32.mrf.mxu1 }
 0x673   :  { %1645 = vst [vmem:[%s2836_s14 + $0x10] sm:$0xff] %v1574_v60 }
 0x674   :  { %v2141_v62 = vpop.f32.mrf.mxu1 }
 0x675   :  { %1648 = vst [vmem:[%s2836_s14 + $0x28] sm:$0xff] %v2141_v62 }
 0x676   :  { %v1584_v53 = vpop.f32.mrf.mxu1 }
 0x677   :  { %1647 = vst [vmem:[%s2836_s14 + $0x20] sm:$0xff] %v1584_v53 }
 0x678   :  { %v2144_v46 = vpop.f32.mrf.mxu1 }
 0x679   :  { %1650 = vst [vmem:[%s2836_s14 + $0x38] sm:$0xff] %v2144_v46 }
 0x67a   :  { %v1594_v31 = vpop.f32.mrf.mxu1 }
 0x67b   :  { %1649 = vst [vmem:[%s2836_s14 + $0x30] sm:$0xff] %v1594_v31 }
 0x67c   :  { %v2147_v33 = vpop.f32.mrf.mxu1 }
 0x67d   :  { %1652 = vst [vmem:[%s2836_s14 + $0x48] sm:$0xff] %v2147_v33 }
 0x67e   :  { %v1604_v37 = vpop.f32.mrf.mxu1 }
 0x67f   :  { %1651 = vst [vmem:[%s2836_s14 + $0x40] sm:$0xff] %v1604_v37 }
 0x680   :  { %v2150_v18 = vpop.f32.mrf.mxu1 }
 0x681   :  { %1654 = vst [vmem:[%s2836_s14 + $0x58] sm:$0xff] %v2150_v18 }
 0x682   :  { %v1614_v19 = vpop.f32.mrf.mxu1 }
 0x683   :  { %1653 = vst [vmem:[%s2836_s14 + $0x50] sm:$0xff] %v1614_v19 }
 0x684   :  { %v2153_v20 = vpop.f32.mrf.mxu1 }
 0x685   :  { %1656 = vst [vmem:[%s2836_s14 + $0x68] sm:$0xff] %v2153_v20 }
 0x686   :  { %v1624_v21 = vpop.f32.mrf.mxu1 }
 0x687   :  { %1655 = vst [vmem:[%s2836_s14 + $0x60] sm:$0xff] %v1624_v21 }
 0x688   :  { %v2156_v22 = vpop.f32.mrf.mxu1 }
 0x689   :  { %1658 = vst [vmem:[%s2836_s14 + $0x78] sm:$0xff] %v2156_v22 }
 0x68a   :  { %v1634_v23 = vpop.f32.mrf.mxu1 }
 0x68b   :  { %1657 = vst [vmem:[%s2836_s14 + $0x70] sm:$0xff] %v1634_v23 }

</bundles_post_ra>
